<compile_context>
chip_gen: v5e
topology: v5e:2x2
jax: 0.10.0
libtpu: 0.0.40
codegen_flags: <defaults>
</compile_context>

<pallas_src>
import jax
import jax.numpy as jnp
from jax.experimental import pallas as pl
from jax.experimental.pallas import tpu as pltpu


def valuenet_kernel(x_ref, w1a_ref, w2t_ref, b2_ref, out_ref):
    # x_ref  : (S+1, TB) feature-major batch tile; last row is constant 1.0
    # w1a_ref: (H, S+1)  fc1 weight with fc1 bias folded in as the last column
    # w2t_ref: (1, H)    fc2 weight, resident in VMEM
    # b2_ref : (1, 1)    fc2 bias, SMEM scalar
    # out_ref: (1, TB)   lane-dense value row
    h = jnp.dot(w1a_ref[...], x_ref[...],
                preferred_element_type=jnp.float32)        # (H, TB) MXU, bias folded in
    h = jnp.maximum(h, 0.0)                                # (H, TB) only full-size VPU op
    v = jnp.dot(w2t_ref[...], h,
                preferred_element_type=jnp.float32)        # (1, TB) MXU, H-wide contraction
    out_ref[...] = (v + b2_ref[0, 0]).astype(out_ref.dtype)


def fold_params(w1, b1, w2, b2):
    """One-time weight prep (fold fc1 bias into an augmented weight column).

    w1: (H, S) fc1.weight; b1: (H,) fc1.bias; w2: (1, H) fc2.weight; b2: () fc2.bias.
    Returns (w1a (H, S+1), w2t (1, H), b2s (1, 1)), all f32.
    """
    w1 = jnp.asarray(w1, jnp.float32)
    b1 = jnp.asarray(b1, jnp.float32).reshape(-1, 1)
    w1a = jnp.concatenate([w1, b1], axis=1)                # (H, S+1)
    w2t = jnp.asarray(w2, jnp.float32).reshape(1, -1)      # (1, H)
    b2s = jnp.asarray(b2, jnp.float32).reshape(1, 1)       # (1, 1)
    return w1a, w2t, b2s


def value_net_forward(x, w1a, w2t, b2s, *, block_b=16384):
    """x: (B, state_dim) f32; params from fold_params. Returns (B, 1) f32."""
    B, S = x.shape
    H, S1 = w1a.shape
    assert S1 == S + 1, "w1a must be the bias-augmented fc1 weight (H, S+1)"

    # ---- batch tile selection (batch lives on the lane axis) -----------------
    b_ceil = pl.cdiv(B, 128) * 128
    tb = max(128, (min(int(block_b), b_ceil) // 128) * 128)
    if b_ceil >= 256:
        # v7x megacore: keep >= 2 grid steps so the "parallel" axis can be
        # sharded across both TensorCores (no-op on v5e/v6e).
        tb = min(tb, max(128, (b_ceil // 2) // 128 * 128))
    n_tiles = pl.cdiv(b_ceil, tb)
    tb = pl.cdiv(pl.cdiv(b_ceil, n_tiles), 128) * 128      # rebalance -> less tail padding
    b_pad = n_tiles * tb

    # ---- input prep: transpose + batch pad + ones row in ONE op --------------
    # Padded batch columns get 1.0 everywhere (harmless; sliced off below); the
    # extra feature row is the constant 1.0 carrying the folded fc1 bias.
    # Callers that already keep x feature-major upstream can skip this HBM pass.
    xa = jnp.pad(x.T, ((0, 1), (0, b_pad - B)), constant_values=1.0)   # (S+1, b_pad)

    # ---- VMEM budget: 2x-buffered x/out blocks + (H, tb) f32 intermediates ---
    vmem_need = 4 * tb * (2 * 8 + 2 * 8 + 2 * H) + 4 * H * 128 + (1 << 16)
    vmem_limit = int(min(56 << 20, max(32 << 20, (5 * vmem_need) // 4)))

    flops = 2 * b_pad * H * (S1 + 1)
    bytes_accessed = 4 * (S1 * b_pad + H * S1 + H + 1 + b_pad)

    out = pl.pallas_call(
        valuenet_kernel,
        out_shape=jax.ShapeDtypeStruct((1, b_pad), jnp.float32),
        grid=(n_tiles,),
        in_specs=[
            pl.BlockSpec((S1, tb), lambda i: (0, i)),            # x tile (pipelined)
            pl.BlockSpec((H, S1), lambda i: (0, 0)),             # w1a resident in VMEM
            pl.BlockSpec((1, H), lambda i: (0, 0)),              # w2t resident in VMEM
            pl.BlockSpec(memory_space=pltpu.MemorySpace.SMEM),   # b2 scalar
        ],
        out_specs=pl.BlockSpec((1, tb), lambda i: (0, i)),
        compiler_params=pltpu.CompilerParams(
            dimension_semantics=("parallel",),
            vmem_limit_bytes=vmem_limit),
        cost_estimate=pl.CostEstimate(
            flops=flops, transcendentals=0, bytes_accessed=bytes_accessed),
    )(xa, w1a, w2t, b2s)

    return out[0, :B].reshape(B, 1)


def init_params(key, state_dim, hidden_dim):
    """Deterministic synthetic init (PyTorch Linear-style uniform bounds)."""
    k1, k2, k3, k4 = jax.random.split(key, 4)
    bound1 = 1.0 / jnp.sqrt(jnp.float32(state_dim))
    bound2 = 1.0 / jnp.sqrt(jnp.float32(hidden_dim))
    w1 = jax.random.uniform(k1, (hidden_dim, state_dim), jnp.float32, -bound1, bound1)
    b1 = jax.random.uniform(k2, (hidden_dim,), jnp.float32, -bound1, bound1)
    w2 = jax.random.uniform(k3, (1, hidden_dim), jnp.float32, -bound2, bound2)
    b2 = jax.random.uniform(k4, (), jnp.float32, -bound2, bound2)
    return w1, b1, w2, b2


def reference(x, w1, b1, w2, b2):
    # Same math as the PyTorch forward: fc2(relu(fc1(x))).
    h = jnp.maximum(x @ w1.T + b1[None, :], 0.0)
    return h @ w2.T + b2


if __name__ == "__main__":
    state_dim = 4       # CartPole-v1 observation dim
    hidden_dim = 128
    batch = 8

    key = jax.random.PRNGKey(0)
    kx, kp, kx2 = jax.random.split(key, 3)
    w1, b1, w2, b2 = init_params(kp, state_dim, hidden_dim)
    w1a, w2t, b2s = fold_params(w1, b1, w2, b2)

    # Small batch: single padded tile.
    x = jax.random.normal(kx, (batch, state_dim), jnp.float32)
    out = jax.block_until_ready(value_net_forward(x, w1a, w2t, b2s))
    ref = reference(x, w1, b1, w2, b2)
    assert out.shape == (batch, 1)
    assert jnp.allclose(out, ref, atol=1e-4, rtol=1e-4)

    # Multi-tile grid + ragged tail: exercises pipelining, the >=2-tile (v7x)
    # cap, tile rebalancing, and the padding path.
    x2 = jax.random.normal(kx2, (300, state_dim), jnp.float32)
    out2 = jax.block_until_ready(value_net_forward(x2, w1a, w2t, b2s, block_b=4096))
    ref2 = reference(x2, w1, b1, w2, b2)
    assert out2.shape == (300, 1)
    assert jnp.allclose(out2, ref2, atol=1e-4, rtol=1e-4)

    print("KERNEL_OK")
</pallas_src>

<mosaic_0001>
module attributes {stable_mosaic.version = 11 : i64} {
  func.func @valuenet_kernel(%arg0: i32, %arg1: memref<5x128xf32, #tpu.memory_space<vmem>>, %arg2: memref<128x5xf32, #tpu.memory_space<vmem>>, %arg3: memref<1x128xf32, #tpu.memory_space<vmem>>, %arg4: memref<1x1xf32, #tpu.memory_space<smem>>, %arg5: memref<1x128xf32, #tpu.memory_space<vmem>>) attributes {dimension_semantics = [#tpu.dimension_semantics<parallel>], iteration_bounds = array<i64: 1>, scalar_prefetch = 0 : i64, scratch_operands = 0 : i64, tpu.core_type = #tpu.core_type<tc>, window_params = [{transform_indices = @transform_0, window_bounds = array<i64: 5, 128>}, {pipeline_mode = #tpu.pipeline_mode<synchronous>, transform_indices = @transform_1, window_bounds = array<i64: 128, 5>}, {pipeline_mode = #tpu.pipeline_mode<synchronous>, transform_indices = @transform_2, window_bounds = array<i64: 1, 128>}, {transform_indices = @transform_3, window_bounds = array<i64: 1, 1>}, {transform_indices = @transform_4, window_bounds = array<i64: 1, 128>}]} {
    %c0 = arith.constant 0 : index
    %c0_0 = arith.constant 0 : index
    %0 = vector.load %arg2[%c0, %c0_0] : memref<128x5xf32, #tpu.memory_space<vmem>>, vector<128x5xf32>
    %c0_1 = arith.constant 0 : index
    %c0_2 = arith.constant 0 : index
    %1 = vector.load %arg1[%c0_1, %c0_2] : memref<5x128xf32, #tpu.memory_space<vmem>>, vector<5x128xf32>
    %cst = arith.constant dense<0.000000e+00> : vector<128x128xf32>
    %2 = tpu.matmul %0, %1, %cst {dimension_numbers = #tpu.dot_dimension_numbers<[1], [0], [0], [1], [0, 0, 1, 1], [], []>} : vector<128x5xf32>, vector<5x128xf32>, vector<128x128xf32> -> vector<128x128xf32>
    %cst_3 = arith.constant 0.000000e+00 : f32
    %3 = vector.broadcast %cst_3 : f32 to vector<128x128xf32>
    %4 = arith.maximumf %2, %3 : vector<128x128xf32>
    %c0_4 = arith.constant 0 : index
    %c0_5 = arith.constant 0 : index
    %5 = vector.load %arg3[%c0_4, %c0_5] : memref<1x128xf32, #tpu.memory_space<vmem>>, vector<1x128xf32>
    %cst_6 = arith.constant dense<0.000000e+00> : vector<1x128xf32>
    %6 = tpu.matmul %5, %4, %cst_6 {dimension_numbers = #tpu.dot_dimension_numbers<[1], [0], [0], [1], [0, 0, 1, 1], [], []>} : vector<1x128xf32>, vector<128x128xf32>, vector<1x128xf32> -> vector<1x128xf32>
    %c0_7 = arith.constant 0 : index
    %c0_8 = arith.constant 0 : index
    %7 = memref.load %arg4[%c0_7, %c0_8] : memref<1x1xf32, #tpu.memory_space<smem>>
    %8 = vector.broadcast %7 : f32 to vector<1x128xf32>
    %9 = arith.addf %6, %8 : vector<1x128xf32>
    %c0_9 = arith.constant 0 : index
    %c0_10 = arith.constant 0 : index
    %10 = vector.load %arg5[%c0_9, %c0_10] : memref<1x128xf32, #tpu.memory_space<vmem>>, vector<1x128xf32>
    tpu.vector_store %arg5[%c0_9, %c0_10], %9 {strides = array<i32>} : memref<1x128xf32, #tpu.memory_space<vmem>>, vector<1x128xf32>,
    return
  }
  func.func @transform_0(%arg0: i32) -> (i32, i32) {
    %c0_i32 = arith.constant 0 : i32
    %c0_i32_0 = arith.constant 0 : i32
    return %c0_i32, %arg0 : i32, i32
  }
  func.func @transform_1(%arg0: i32) -> (i32, i32) {
    %c0_i32 = arith.constant 0 : i32
    %c0_i32_0 = arith.constant 0 : i32
    %c0_i32_1 = arith.constant 0 : i32
    return %c0_i32, %c0_i32_0 : i32, i32
  }
  func.func @transform_2(%arg0: i32) -> (i32, i32) {
    %c0_i32 = arith.constant 0 : i32
    %c0_i32_0 = arith.constant 0 : i32
    %c0_i32_1 = arith.constant 0 : i32
    return %c0_i32, %c0_i32_0 : i32, i32
  }
  func.func @transform_3(%arg0: i32) -> (i32, i32) {
    %c0_i32 = arith.constant 0 : i32
    %c0_i32_0 = arith.constant 0 : i32
    %c0_i32_1 = arith.constant 0 : i32
    return %c0_i32, %c0_i32_0 : i32, i32
  }
  func.func @transform_4(%arg0: i32) -> (i32, i32) {
    %c0_i32 = arith.constant 0 : i32
    %c0_i32_0 = arith.constant 0 : i32
    return %c0_i32, %arg0 : i32, i32
  }
}

</mosaic_0001>

<bundles_post_ra>
// kernel: tpu_custom_call.1
= control target key start
LH: loop header
LB: loop body
LE: loop exit
PB: predicated region body
PF: predicated region fallthrough
CT: control target
= control target key end

     0   :  { %vm85_vm0 = vcmask 1044480   ;;  %vm36_vm1 = vcmask 39936   ;;  %s358_s0 = inlined_call_operand.vmem [shape: f32[5,128], index: 0, kind: input, shape index: {}]   ;;  %s359_s1 = inlined_call_operand.vmem [shape: f32[128,5], index: 1, kind: input, shape index: {}]   ;;  %s360_s2 = inlined_call_operand.vmem [shape: f32[1,128], index: 2, kind: input, shape index: {}]   ;;  %s361_s3 = inlined_call_operand.<no memory space> [shape: f32[1,1], index: 3, kind: input, shape index: {}]   ;;  %s362_s4 = inlined_call_operand.hbm [shape: f32[1,128], index: 4, kind: output, shape index: {}]  }
   0x1   :  { %v35_v0 = vld [vmem:[%s358_s0] sm:$0x1f]  ;;  %v25_v1 = vld [vmem:[%s359_s1 + $0x30] sm:$0xff] }
   0x2   :  { %v31_v2 = vld [vmem:[%s359_s1 + $0x60] sm:$0xff]  ;;  %227 = vmatpush.msk.msra.mxu2 %vm85_vm0, %v35_v0  ;;  %228 = vmatpush.msk.msra.mxu3 %vm85_vm0, %v35_v0 }
   0x3   :  { %217 = vmatmul.msk.f32.vlgmr.msra.gmra.mxu2 %vm36_vm1, %v25_v1  ;;  %223 = vmatmul.msk.f32.vlgmr.msra.gmra.mxu3 %vm36_vm1, %v31_v2  ;;  %v19_v3 = vld [vmem:[%s359_s1] sm:$0xff] }
   0x4   :  { %210 = vmatpush.msk.msra.mxu0 %vm85_vm0, %v35_v0 }
   0x5   :  { %211 = vmatmul.msk.f32.vlgmr.msra.gmra.mxu0 %vm36_vm1, %v19_v3 }
   0x6   :  { %10 = vsyncpa [#allocation4], 0  ;;  %v26_v4 = vld [vmem:[%s359_s1 + $0x38] sm:$0xff]  ;;  %v32_v5 = vld [vmem:[%s359_s1 + $0x68] sm:$0xff]  ;;  %v172_v50 = vstv %s361_s3  ;;  %s256_s24 = smov [#allocation3]   ;;  %s201_s28 = sshll.u32 %s362_s4, 4  ;;  %s202_s28 = int_to_ptr.hbm [resolvable:$true] %s201_s28 }
   0x7   :  { %v20_v6 = vld [vmem:[%s359_s1 + $0x8] sm:$0xff]  ;;  %v27_v7 = vld [vmem:[%s359_s1 + $0x40] sm:$0xff]  ;;  %v33_v8 = vld [vmem:[%s359_s1 + $0x70] sm:$0xff]  ;;  %s199_s25 = sshll.u32 %s256_s24, 4  ;;  %s200_s25 = int_to_ptr.vmem [resolvable:$true] %s199_s25 }
   0x8   :  { %v21_v9 = vld [vmem:[%s359_s1 + $0x10] sm:$0xff]  ;;  %v28_v10 = vld [vmem:[%s359_s1 + $0x48] sm:$0xff]  ;;  %v34_v11 = vld [vmem:[%s359_s1 + $0x78] sm:$0xff] }
   0x9   :  { %v22_v12 = vld [vmem:[%s359_s1 + $0x18] sm:$0xff]  ;;  %v29_v13 = vld [vmem:[%s359_s1 + $0x50] sm:$0xff]  ;;  %v23_v14 = vld [vmem:[%s359_s1 + $0x20] sm:$0xff] }
   0xa   :  { %v30_v15 = vld [vmem:[%s359_s1 + $0x58] sm:$0xff]  ;;  %v24_v16 = vld [vmem:[%s359_s1 + $0x28] sm:$0xff]  ;;  %v170_v49 = vld [vmem:[%s360_s2] sm:$0x1] }
   0xb   :  { %218 = vmatmul.msk.f32.gmra.mxu2 %vm36_vm1, %v26_v4  ;;  %224 = vmatmul.msk.f32.gmra.mxu3 %vm36_vm1, %v32_v5 }
   0xd   :  { %212 = vmatmul.msk.f32.gmra.mxu0 %vm36_vm1, %v20_v6 }
  0x13   :  { %219 = vmatmul.msk.f32.gmra.mxu2 %vm36_vm1, %v27_v7  ;;  %225 = vmatmul.msk.f32.gmra.mxu3 %vm36_vm1, %v33_v8 }
  0x15   :  { %213 = vmatmul.msk.f32.gmra.mxu0 %vm36_vm1, %v21_v9 }
  0x1b   :  { %220 = vmatmul.msk.f32.gmra.mxu2 %vm36_vm1, %v28_v10  ;;  %226 = vmatmul.msk.f32.gmra.mxu3 %vm36_vm1, %v34_v11 }
  0x1d   :  { %214 = vmatmul.msk.f32.gmra.mxu0 %vm36_vm1, %v22_v12 }
  0x23   :  { %221 = vmatmul.msk.f32.gmra.mxu2 %vm36_vm1, %v29_v13 }
  0x25   :  { %215 = vmatmul.msk.f32.gmra.mxu0 %vm36_vm1, %v23_v14 }
  0x2b   :  { %222 = vmatmul.msk.f32.gmra.mxu2 %vm36_vm1, %v30_v15 }
  0x2d   :  { %216 = vmatmul.msk.f32.gmra.mxu0 %vm36_vm1, %v24_v16 }
  0x82   :  { %v106_v17 = vpop.f32.mrf.mxu0 }
  0x83   :  { %v154_v48 = vmax.f32 %v106_v17, 0.0 }
  0x86   :  { %v124_v18 = vpop.f32.mrf.mxu2  ;;  %v142_v19 = vpop.f32.mrf.mxu3 }
  0x87   :  { %v166_v32 = vmax.f32 %v142_v19, 0.0  ;;  %v160_v42 = vmax.f32 %v124_v18, 0.0 }
  0x8a   :  { %v109_v20 = vpop.f32.mrf.mxu0 }
  0x8b   :  { %v155_v47 = vmax.f32 %v109_v20, 0.0 }
  0x8e   :  { %v127_v21 = vpop.f32.mrf.mxu2  ;;  %v145_v22 = vpop.f32.mrf.mxu3 }
  0x8f   :  { %v167_v31 = vmax.f32 %v145_v22, 0.0  ;;  %v161_v41 = vmax.f32 %v127_v21, 0.0 }
  0x92   :  { %v112_v25 = vpop.f32.mrf.mxu0 }
  0x93   :  { %v156_v46 = vmax.f32 %v112_v25, 0.0 }
  0x96   :  { %v130_v23 = vpop.f32.mrf.mxu2  ;;  %v148_v24 = vpop.f32.mrf.mxu3 }
  0x97   :  { %v168_v29 = vmax.f32 %v148_v24, 0.0  ;;  %v162_v39 = vmax.f32 %v130_v23, 0.0 }
  0x9a   :  { %v115_v30 = vpop.f32.mrf.mxu0 }
  0x9b   :  { %v157_v45 = vmax.f32 %v115_v30, 0.0 }
  0x9e   :  { %v133_v26 = vpop.f32.mrf.mxu2  ;;  %v151_v27 = vpop.f32.mrf.mxu3 }
  0x9f   :  { %v169_v28 = vmax.f32 %v151_v27, 0.0  ;;  %v163_v38 = vmax.f32 %v133_v26, 0.0 }
  0xa1   :  { %173 = vmatpush.msra.mxu1 %v169_v28 }
  0xa2   :  { %v118_v34 = vpop.f32.mrf.mxu0 }
  0xa3   :  { %174 = vmatpush.msra.mxu1 %v168_v29  ;;  %v158_v44 = vmax.f32 %v118_v34, 0.0 }
  0xa5   :  { %175 = vmatpush.msra.mxu1 %v167_v31 }
  0xa6   :  { %v136_v33 = vpop.f32.mrf.mxu2 }
  0xa7   :  { %176 = vmatpush.msra.mxu1 %v166_v32  ;;  %v164_v37 = vmax.f32 %v136_v33, 0.0 }
  0xaa   :  { %v121_v40 = vpop.f32.mrf.mxu0 }
  0xab   :  { %v159_v43 = vmax.f32 %v121_v40, 0.0 }
  0xae   :  { %v139_v35 = vpop.f32.mrf.mxu2 }
  0xaf   :  { %v165_v36 = vmax.f32 %v139_v35, 0.0 }
  0xb1   :  { %177 = vmatpush.msra.mxu1 %v165_v36 }
  0xb3   :  { %178 = vmatpush.msra.mxu1 %v164_v37 }
  0xb5   :  { %179 = vmatpush.msra.mxu1 %v163_v38 }
  0xb7   :  { %180 = vmatpush.msra.mxu1 %v162_v39 }
  0xb9   :  { %181 = vmatpush.msra.mxu1 %v161_v41 }
  0xbb   :  { %182 = vmatpush.msra.mxu1 %v160_v42 }
  0xbd   :  { %183 = vmatpush.msra.mxu1 %v159_v43 }
  0xbf   :  { %184 = vmatpush.msra.mxu1 %v158_v44 }
  0xc1   :  { %185 = vmatpush.msra.mxu1 %v157_v45 }
  0xc3   :  { %186 = vmatpush.msra.mxu1 %v156_v46 }
  0xc5   :  { %187 = vmatpush.msra.mxu1 %v155_v47 }
  0xc7   :  { %188 = vmatpush.msra.mxu1 %v154_v48 }
  0xc8   :  { %189 = vmatmul.f32.vlgmr.msra.gmra.mxu1 %v170_v49 }
 0x145   :  { %v190_v51 = vpop.f32.mrf.mxu1 }
 0x146   :  { %v191_v52 = vadd.f32 %v190_v51, %v172_v50 }
 0x148   :  { %193 = vst [vmem:[#allocation3] sm:$0x1] %v191_v52 }
 0x149   :  { %204 = dma.vmem_to_hbm [thread:$0]  %s200_s25, 16, %s202_s28, [#allocation4]  }
 0x14a   :  { %254 = dma.done.wait [#allocation4], 16  }
 0x14b   :  { %255 = vsyncadd [#allocation4], 4294967280 }
 0x14c   :  { %209 = vsyncpa [#allocation4], 1 }

</bundles_post_ra>
